<compile_context>
chip_gen: v5e
topology: v5e:2x2
jax: 0.10.0
libtpu: 0.0.40
codegen_flags: <defaults>
</compile_context>

<pallas_src>
import jax
import jax.numpy as jnp
from jax.experimental import pallas as pl
from jax.experimental.pallas import tpu as pltpu


def _round_up(v, m):
    return ((v + m - 1) // m) * m


def _res_block_kernel(x_ref, w_ref, o_ref):
    """One (ROWS, T_HW) block: o = x + relu(W_bd @ x)."""
    x = x_ref[...]                               # (ROWS, T_HW) activations
    w = w_ref[...]                               # (ROWS, ROWS) f32 block-diag weight
    if x.dtype != jnp.float32:
        # Single rounding of the f32 weight to the activation dtype so the MXU
        # runs in low precision; accumulation below stays f32.
        w = w.astype(x.dtype)
    # 1x1 conv == channel contraction, done on the MXU with f32 accumulation.
    y = jnp.dot(w, x, preferred_element_type=jnp.float32)
    y = jnp.maximum(y, 0.0)                      # ReLU
    # Residual add in f32, cast once on store (lane-dense, sublane-dense).
    o_ref[...] = (x.astype(jnp.float32) + y).astype(o_ref.dtype)


def res_block(x_nchw, weight_oi, *,
              vmem_budget_bytes=12 * 1024 * 1024,
              donate_x=False):
    """Fused RES_Block forward: out = x + relu(conv1x1(x)).

    x_nchw:    (N, C, H, W) activations (f32 or bf16).
    weight_oi: (C_out, C_in) — PyTorch 1x1 conv weight [out, in, 1, 1] squeezed.
    Requires C_out == C_in (residual add), as in the PyTorch module's usage.
    """
    n, c, h, w_sp = x_nchw.shape
    c_out, c_in = weight_oi.shape
    assert c_in == c and c_out == c, "residual add requires in_dim == out_dim"

    hw = h * w_sp
    itemsize = jnp.dtype(x_nchw.dtype).itemsize
    sublane = max(8, 32 // max(itemsize, 1))      # 8 for f32, 16 for bf16

    # ---- choose TB (batches per grid step) --------------------------------
    # Legality: the block row count TB*C must be a multiple of 8 or equal the
    # full N*C extent (the (8,128) BlockSpec rule).
    legal = [d for d in range(1, n + 1)
             if n % d == 0 and ((d * c) % 8 == 0 or d == n)]
    ROW_CAP = 256   # keeps kron(I_TB, W) tiny and the MXU well under the HBM roofline
    capped = [d for d in legal if d * c <= ROW_CAP] or [min(legal)]
    per_batch_bytes = c * hw * itemsize
    # Amortize ~0.35us per-step overhead: aim for ~512 KiB of activations/step.
    target_tb = max(1, (512 * 1024) // max(per_batch_bytes, 1))
    geq = [d for d in capped if d >= target_tb]
    tb = min(geq) if geq else max(capped)
    rows = tb * c
    num_b = n // tb

    # ---- weight: block-diagonal kron(I_TB, W), kept f32 (review item 6) ----
    w_f32 = weight_oi.astype(jnp.float32)
    w_bd = w_f32 if tb == 1 else jnp.kron(jnp.eye(tb, dtype=jnp.float32), w_f32)

    # ---- VMEM accounting (review item 2) -----------------------------------
    rows_pad = _round_up(rows, sublane)                          # activation sublane padding
    w_bytes = _round_up(rows, 8) * _round_up(rows, 128) * 4      # padded f32 weight block
    tile_budget = max(vmem_budget_bytes - 2 * w_bytes, 256 * 1024)
    max_t = tile_budget // (4 * rows_pad * itemsize)             # in+out, double-buffered
    if hw <= 128 or max_t >= hw:
        t_hw = hw                                   # full spatial extent (always legal)
    else:
        t_hw = max(128, (min(max_t, hw) // 128) * 128)   # lane-dense tiles; tail masked
    num_s = pl.cdiv(hw, t_hw)

    # ---- feed both v7x TensorCores on tiny shapes (review item 3) ----------
    if num_b * num_s < 2 and hw >= 256:
        t_hw = max(128, ((hw // 2) // 128) * 128)
        num_s = pl.cdiv(hw, t_hw)

    footprint = 2 * w_bytes + 4 * rows_pad * _round_up(t_hw, 128) * itemsize
    vmem_limit = max(16 * 1024 * 1024, int(footprint * 1.25) + 2 * 1024 * 1024)

    # Free reshape: (N, C) and (H, W) are adjacent contiguous dims.
    x2 = x_nchw.reshape(n * c, hw)

    flops = 2 * n * hw * c * c + 2 * n * c * hw
    bytes_accessed = 2 * n * c * hw * itemsize + rows * rows * 4

    out2 = pl.pallas_call(
        _res_block_kernel,
        out_shape=jax.ShapeDtypeStruct((n * c, hw), x_nchw.dtype),
        grid_spec=pltpu.PrefetchScalarGridSpec(
            num_scalar_prefetch=0,
            grid=(num_b, num_s),
            in_specs=[
                # activations: (TB*C, T_HW) dense blocks
                pl.BlockSpec((rows, t_hw), lambda b, s: (b, s)),
                # block-diagonal weight, resident in VMEM, constant across grid
                pl.BlockSpec((rows, rows), lambda b, s: (0, 0)),
            ],
            out_specs=pl.BlockSpec((rows, t_hw), lambda b, s: (b, s)),
        ),
        compiler_params=pltpu.CompilerParams(
            dimension_semantics=("parallel", "parallel"),
            vmem_limit_bytes=vmem_limit,
        ),
        cost_estimate=pl.CostEstimate(
            flops=flops, transcendentals=0, bytes_accessed=bytes_accessed),
        input_output_aliases=({0: 0} if donate_x else {}),
    )(x2, w_bd)

    # Free reshape back to NCHW.
    return out2.reshape(n, c, h, w_sp)


if __name__ == "__main__":
    key = jax.random.PRNGKey(0)
    kx, kw = jax.random.split(key)

    N, C, H, W = 2, 4, 16, 16          # in_dim == out_dim == 4
    x = jax.random.normal(kx, (N, C, H, W), dtype=jnp.float32)
    # Deterministic synthetic 1x1-conv weight, PyTorch layout (out, in).
    weight = jax.random.normal(kw, (C, C), dtype=jnp.float32) * 0.1

    out = res_block(x, weight)
    out = jax.block_until_ready(out)

    # Pure-JAX reference: 1x1 conv == einsum over channels, then ReLU, then add.
    ref = x + jnp.maximum(jnp.einsum("oi,nihw->nohw", weight, x), 0.0)
    assert out.shape == (N, C, H, W)
    assert jnp.allclose(out, ref, atol=1e-5, rtol=1e-5)

    print("KERNEL_OK")
</pallas_src>

<mosaic_0001>
module attributes {stable_mosaic.version = 11 : i64} {
  func.func @_res_block_kernel(%arg0: i32, %arg1: i32, %arg2: memref<8x128xf32, #tpu.memory_space<vmem>>, %arg3: memref<8x8xf32, #tpu.memory_space<vmem>>, %arg4: memref<8x128xf32, #tpu.memory_space<vmem>>) attributes {dimension_semantics = [#tpu.dimension_semantics<parallel>, #tpu.dimension_semantics<parallel>], iteration_bounds = array<i64: 1, 2>, scalar_prefetch = 0 : i64, scratch_operands = 0 : i64, tpu.core_type = #tpu.core_type<tc>, window_params = [{transform_indices = @transform_0, window_bounds = array<i64: 8, 128>}, {pipeline_mode = #tpu.pipeline_mode<synchronous>, transform_indices = @transform_1, window_bounds = array<i64: 8, 8>}, {transform_indices = @transform_2, window_bounds = array<i64: 8, 128>}]} {
    %c0 = arith.constant 0 : index
    %c0_0 = arith.constant 0 : index
    %0 = vector.load %arg2[%c0, %c0_0] : memref<8x128xf32, #tpu.memory_space<vmem>>, vector<8x128xf32>
    %c0_1 = arith.constant 0 : index
    %c0_2 = arith.constant 0 : index
    %1 = vector.load %arg3[%c0_1, %c0_2] : memref<8x8xf32, #tpu.memory_space<vmem>>, vector<8x8xf32>
    %cst = arith.constant dense<0.000000e+00> : vector<8x128xf32>
    %2 = tpu.matmul %1, %0, %cst {dimension_numbers = #tpu.dot_dimension_numbers<[1], [0], [0], [1], [0, 0, 1, 1], [], []>} : vector<8x8xf32>, vector<8x128xf32>, vector<8x128xf32> -> vector<8x128xf32>
    %cst_3 = arith.constant 0.000000e+00 : f32
    %3 = vector.broadcast %cst_3 : f32 to vector<8x128xf32>
    %4 = arith.maximumf %2, %3 : vector<8x128xf32>
    %5 = arith.addf %0, %4 : vector<8x128xf32>
    %c0_4 = arith.constant 0 : index
    %c0_5 = arith.constant 0 : index
    %6 = vector.load %arg4[%c0_4, %c0_5] : memref<8x128xf32, #tpu.memory_space<vmem>>, vector<8x128xf32>
    tpu.vector_store %arg4[%c0_4, %c0_5], %5 {strides = array<i32>} : memref<8x128xf32, #tpu.memory_space<vmem>>, vector<8x128xf32>,
    return
  }
  func.func @transform_0(%arg0: i32, %arg1: i32) -> (i32, i32) {
    %c0_i32 = arith.constant 0 : i32
    return %arg0, %arg1 : i32, i32
  }
  func.func @transform_1(%arg0: i32, %arg1: i32) -> (i32, i32) {
    %c0_i32 = arith.constant 0 : i32
    %c0_i32_0 = arith.constant 0 : i32
    %c0_i32_1 = arith.constant 0 : i32
    return %c0_i32, %c0_i32_0 : i32, i32
  }
  func.func @transform_2(%arg0: i32, %arg1: i32) -> (i32, i32) {
    %c0_i32 = arith.constant 0 : i32
    return %arg0, %arg1 : i32, i32
  }
}

</mosaic_0001>

<bundles_post_ra>
// kernel: tpu_custom_call.1
= control target key start
LH: loop header
LB: loop body
LE: loop exit
PB: predicated region body
PF: predicated region fallthrough
CT: control target
= control target key end

     0   :  { %7 = vsyncpa [#allocation3], 0  ;;  %s735_s0 = inlined_call_operand.hbm [shape: f32[8,256], index: 0, kind: input, shape index: {}]   ;;  %s736_s1 = inlined_call_operand.hbm [shape: f32[8,8], index: 1, kind: input, shape index: {}]   ;;  %s737_s2 = inlined_call_operand.hbm [shape: f32[8,256], index: 2, kind: output, shape index: {}]  }
   0x1   :  { %9 = vsyncpa [#allocation3 + $0x1], 0 }
   0x2   :  { %10 = vsyncpa [#allocation6], 0 }
   0x3   :  { %11 = vsyncpa [#allocation4], 0 }
   0x4   :  { %13 = vsyncpa [#allocation4 + $0x1], 0  ;;  %s586_s9 = smov 0   ;;  %s588_s10 = smov 0  }
   0x5   :  { %s590_s11 = smov 0   ;;  %s592_s12 = smov 0  }
   0x6   :  { %s594_s13 = smov 0   ;;  %s596_s14 = smov 0  }
   0x7 LB: > { %s333_s15 = sadd.s32 4294967295, %s568_s14   ;;  %s334_s16 = sadd.s32 4294967294, %s568_s14   ;;  %s568_s14 = sphi %s596_s14, %s19_s14   ;;  %s564_s13 = sphi %s594_s13, %s749_s13   ;;  %s560_s12 = sphi %s592_s12, %s748_s12   ;;  %s556_s11 = sphi %s590_s11, %s747_s11   ;;  %s552_s10 = sphi %s588_s10, %s746_s10   ;;  %s548_s9 = sphi %s586_s9, %s745_s9  }
   0x8   : > { %p53_p0 = scmp.ne.s32.totalorder %s552_s10, %s548_s9  ;;  %p620_p1 = scmp.eq.s32.totalorder %s333_s15, 0 }
   0x9   : > { %p624_p2 = scmp.eq.s32.totalorder %s333_s15, 1  ;;  %p106_p3 = scmp.eq.s32.totalorder %s334_s16, 1 }
   0xa   : > { %p630_p4 = por %p620_p1, %p53_p0  ;;  %p335_p5 = scmp.ge.s32.totalorder %s568_s14, 1 }
   0xb   : > { %p635_p6 = por %p106_p3, %p53_p0  ;;  %p113_p7 = scmp.lt.s32.totalorder %s568_s14, 3 }
   0xc   : > { %s125_s23 = sshll.u32 %s736_s1, 4  ;;  %p337_p9 = scmp.ge.s32.totalorder %s568_s14, 2  ;;  %s126_s23 = int_to_ptr.hbm [resolvable:$true] %s125_s23 }
   0xd   : > { %p643_p8 = pnand %p335_p5, %p113_p7  ;;  %s570_s25 = smov [#allocation5]  }
   0xe   : > { %s127_s26 = sshll.u32 %s570_s25, 4  ;;  %s28_s27 = sadd.s32 1, %s564_s13  ;;  %s128_s26 = int_to_ptr.vmem [resolvable:$true] %s127_s26 }
   0xf   : > { %p357_p10 = pneg %p643_p8  ;;  %p29_p12 = scmp.ge.s32.totalorder %s28_s27, 2 }
  0x10   : > { %s40_s28 = sadd.s32 1, %s556_s11  ;;  %p47_p13 = scmp.ne.s32.totalorder %s556_s11, %s552_s10 }
  0x11   : > { %p358_p11 = pnand %p357_p10, %p620_p1  ;;  %p48_p0 = scmp.eq.s32.totalorder %s568_s14, 0 }
  0x12   : > { %s751_s27 = smov (%p29_p12, %s28_s27), 0  ;;  %p665_p5 = por %p624_p2, %p47_p13 }
  0x13   : > { %360 = dma.hbm_to_vmem [thread:$0]  (!%p358_p11), %s126_s23, 128, %s128_s26, [#allocation6]  }
  0x14   : > { %p659_p3 = por %p48_p0, %p47_p13  ;;  %s36_s3 = ssub.s32 %s564_s13, %s751_s27 }
  0x15   : > { %p370_p7 = scmp.lt.s32.totalorder %s568_s14, 2  ;;  %p38_p10 = scmp.eq.s32.totalorder %s36_s3, 0 }
  0x16   : > { %s138_s4 = sand.u32 1, %s556_s11   ;;  %s339_s7 = sshll.u32 %s564_s13, 3 }
  0x17   : > { %s338_s5 = sshll.u32 %s138_s4, 3  ;;  %s148_s16 = scalar_lea.hbm %s735_s0, %s339_s7 }
  0x18   : > { %s674_s6 = scalar_select %p38_p10, %s556_s11, %s40_s28  }
  0x19   : > { %s142_s21 = scalar_lea.vmem [#allocation2], %s338_s5  ;;  %s150_s18 = sshll.u32 %s148_s16, 4  ;;  %s151_s18 = int_to_ptr.hbm [resolvable:$true] %s150_s18 }
  0x1a   : > { %s152_s22 = sshll.u32 %s142_s21, 4  ;;  %p362_p2 = pnand %p370_p7, %p659_p3  ;;  %s153_s22 = int_to_ptr.vmem [resolvable:$true] %s152_s22 }
  0x1b   : > { %s139_s23 = scalar_lea.sflag [#allocation3], %s138_s4  ;;  %161 = sbr.rel (%p643_p8) target bundleno = 170 (0xaa), region = 28 }
  0x1c   : > { %364 = dma.hbm_to_vmem [thread:$0]  (!%p362_p2), %s151_s18, 128, %s153_s22, %s139_s23  }
  0x1d   : > { %s685_s25 = sand.u32 (!%p643_p8), 1, %s552_s10  }
  0x1e   : > { %s341_s26 = sshll.u32 (!%p643_p8), %s685_s25, 3  ;;  %s164_s28 = scalar_lea.sflag (!%p643_p8), [#allocation3], %s685_s25 }
  0x1f   : > { %s167_s3 = scalar_lea.vmem (!%p643_p8), [#allocation2], %s341_s26 }
  0x20   : > { %535 = dma.done.wait (%p630_p4), %s164_s28, 128  }
  0x21   : > { %537 = vsyncadd (%p630_p4), %s164_s28, 4294967168 }
  0x22   : > { %539 = dma.done.wait (%p620_p1), [#allocation6], 128  }
  0x23   : > { %541 = vsyncadd (%p620_p1), [#allocation6], 4294967168  ;;  %vm196_vm0 = vcmask 64512   ;;  %v194_v0 = vld [vmem:[%s167_s3] sm:$0xff]  ;;  %v195_v1 = vld [vmem:[#allocation5] sm:$0xff]  ;;  %s346_s24 = sshll.u32 %s560_s12, 3 }
  0x24   : > { %215 = vmatpush.msra.mxu0 %v194_v0  ;;  %s236_s19 = scalar_lea.hbm %s737_s2, %s346_s24  ;;  %s193_s5 = scalar_lea.vmem [#allocation7], %s341_s26 }
  0x25   : > { %344 = vmatmul.msk.f32.vlgmr.msra.gmra.mxu0 %vm196_vm0, %v195_v1  ;;  %s238_s7 = sshll.u32 %s193_s5, 4  ;;  %s240_s8 = sshll.u32 %s236_s19, 4  ;;  %s239_s7 = int_to_ptr.vmem [resolvable:$true] %s238_s7  ;;  %s241_s8 = int_to_ptr.hbm [resolvable:$true] %s240_s8 }
  0x26   : > { %s224_s17 = scalar_lea.sflag [#allocation4], %s685_s25  ;;  %s496_s15 = sshra.s32 %s241_s8, 4  ;;  %s497_s15 = int_to_ptr.hbm [resolvable:$true] %s496_s15 }
  0x27   : > { %s498_s16 = scalar_lea.hbm %s497_s15, 8  ;;  %s502_s22 = scalar_lea.hbm %s737_s2, 16 }
  0x28   : > { %p499_p1 = scmp.ne.s32.totalorder %s497_s15, %s498_s16  ;;  %p503_p11 = scmp.lt.s32.totalorder %s497_s15, %s737_s2 }
  0x29   : > { %p504_p12 = scmp.lt.s32.totalorder %s502_s22, %s498_s16 }
  0x2a   : > { %p500_p4 = pnand %p499_p1, %p665_p5 }
  0x2b   : > { %p505_p13 = por %p504_p12, %p503_p11 }
  0x2c   : > { %p501_p8 = pneg %p500_p4 }
  0x2e   : > { %p506_p0 = pnand %p505_p13, %p501_p8 }
  0xa2   : > { %v217_v2 = vpop.f32.mrf.mxu0 }
  0xa3   : > { %v220_v3 = vmax.f32 %v217_v2, 0.0 }
  0xa5   : > { %v221_v4 = vadd.f32 %v220_v3, %v194_v0 }
  0xa7   : > { %222 = vst [vmem:[%s193_s5] sm:$0xff] %v221_v4 }
  0xa8   : > { %509 = shalt.err (!%p506_p0)
}
  0xa9   : > { %355 = dma.vmem_to_hbm [thread:$0]  (%p665_p5), %s239_s7, 128, %s241_s8, %s224_s17  }
  0xaa PF: > { %s252_s25 = sand.u32 1, %s548_s9   ;;  %p366_p3 = pnand %p337_p9, %p635_p6 }
  0xab   : > { %s253_s26 = scalar_lea.sflag [#allocation4], %s252_s25 }
  0xac   : > { %p367_p7 = pneg %p366_p3 }
  0xae   : > { %543 = dma.done.wait (%p367_p7), %s253_s26, 128  }
  0xaf   : > { %545 = vsyncadd (%p367_p7), %s253_s26, 4294967168  ;;  %s19_s14 = sadd.s32 1, %s568_s14   ;;  %s745_s9 = smov %s552_s10 }
  0xb0   : > { %p16_p10 = scmp.ge.s32.totalorder %s19_s14, 4   ;;  %s746_s10 = smov %s556_s11 }
  0xb1   : > { %s747_s11 = smov %s674_s6  ;;  %s748_s12 = smov %s564_s13 }
  0xb2   : > { %s749_s13 = smov %s751_s27  ;;  %18 = sbr.rel (!%p16_p10) target bundleno = 7 (0x7), region = 77 }
  0xb7   :  { %259 = vsyncpa [#allocation3], 1 }
  0xb8   :  { %261 = vsyncpa [#allocation3 + $0x1], 1 }
  0xb9   :  { %262 = vsyncpa [#allocation6], 1 }
  0xba   :  { %263 = vsyncpa [#allocation4], 1 }
  0xbb   :  { %265 = vsyncpa [#allocation4 + $0x1], 1 }

</bundles_post_ra>
